<compile_context>
chip_gen: v6e
topology: v6e:2x2x1
jax: 0.10.0
libtpu: 0.0.40
codegen_flags: <defaults>
</compile_context>

<pallas_src>
import functools

import jax
import jax.numpy as jnp
from jax.experimental import pallas as pl
from jax.experimental.pallas import tpu as pltpu


def _global_attn_kernel(his_ref, v_ref, out_ref):
    # his_ref: (BT, N, Dh)   v_ref: (BT, Dh)   out_ref: (BT, Dh)
    # Compute in f32 regardless of input dtype (f32 accumulation).
    his = his_ref[...].astype(jnp.float32)                      # (BT, N, Dh)
    v = v_ref[...].astype(jnp.float32)                          # (BT, Dh)

    # attention logits: lane-wise (XLU) reduce of his * v  -> (BT, N, 1)
    attn = jnp.sum(his * v[:, None, :], axis=-1, keepdims=True)

    # weighted sum over the history axis (sublane reduce)   -> (BT, Dh)
    out_ref[...] = jnp.sum(his * attn, axis=1).astype(out_ref.dtype)


@functools.partial(jax.jit, static_argnames=("batch_tile",))
def global_attn(his, global_pref, weight, *, batch_tile=8):
    """
    his:         (B, N, his_dim)
    global_pref: (B, global_dim)
    weight:      (global_dim, his_dim)   (nn.Linear weight layout)
    returns:     (B, his_dim)
    """
    B, N, Dh = his.shape

    # v_b = gp_b @ W  -> (B, Dh): tiny matmul done once in XLA; the weight
    # never occupies VMEM inside the kernel.
    v = jnp.dot(global_pref, weight, preferred_element_type=jnp.float32)
    v = v.astype(his.dtype)

    # Batch tile: >=8 rows per grid step when possible (sublane-aligned output
    # stores, amortized per-step overhead).  For very large N one would add a
    # second "arbitrary" grid axis over N-chunks with an f32 accumulator in
    # scratch; at typical history lengths the whole (BT, N, Dh) slab is tiny
    # relative to VMEM (even on v7x's 64 MiB), so a single block over N is fine.
    bt = min(batch_tile, B)
    n_tiles = pl.cdiv(B, bt)
    Bp = n_tiles * bt
    if Bp != B:
        his_in = jnp.pad(his, ((0, Bp - B), (0, 0), (0, 0)))
        v_in = jnp.pad(v, ((0, Bp - B), (0, 0)))
    else:
        his_in, v_in = his, v

    out = pl.pallas_call(
        _global_attn_kernel,
        out_shape=jax.ShapeDtypeStruct((Bp, Dh), his.dtype),
        grid_spec=pltpu.PrefetchScalarGridSpec(
            num_scalar_prefetch=0,
            grid=(n_tiles,),
            in_specs=[
                pl.BlockSpec((bt, N, Dh), lambda b: (b, 0, 0)),
                pl.BlockSpec((bt, Dh), lambda b: (b, 0)),
            ],
            out_specs=pl.BlockSpec((bt, Dh), lambda b: (b, 0)),
        ),
        compiler_params=pltpu.CompilerParams(
            dimension_semantics=("parallel",),
        ),
    )(his_in, v_in)

    return out[:B] if Bp != B else out


def _xavier_uniform(key, fan_out, fan_in, dtype=jnp.float32):
    # matches nn.init.xavier_uniform_ for a (fan_out, fan_in) Linear weight
    limit = (6.0 / (fan_in + fan_out)) ** 0.5
    return jax.random.uniform(key, (fan_out, fan_in), dtype, -limit, limit)


def _reference(his, global_pref, weight):
    proj = jnp.einsum("bnh,gh->bng", his, weight)                # W(his)
    attn = jnp.einsum("bng,bg->bn", proj, global_pref)[..., None]
    return jnp.sum(his * attn, axis=-2)


if __name__ == "__main__":
    B, N, HIS_DIM, GLOBAL_DIM = 2, 8, 32, 16

    key = jax.random.PRNGKey(0)
    k_w, k_his, k_gp = jax.random.split(key, 3)

    weight = _xavier_uniform(k_w, GLOBAL_DIM, HIS_DIM)           # (global_dim, his_dim)
    his = jax.random.normal(k_his, (B, N, HIS_DIM), jnp.float32)
    global_pref = jax.random.normal(k_gp, (B, GLOBAL_DIM), jnp.float32)

    out = global_attn(his, global_pref, weight)
    out = jax.block_until_ready(out)

    ref = _reference(his, global_pref, weight)
    assert out.shape == (B, HIS_DIM)
    assert jnp.allclose(out, ref, atol=1e-4, rtol=1e-4), "mismatch vs reference"

    print("KERNEL_OK")
</pallas_src>

<mosaic_0001>
module attributes {stable_mosaic.version = 11 : i64} {
  func.func @_global_attn_kernel(%arg0: i32, %arg1: memref<2x8x32xf32, #tpu.memory_space<vmem>>, %arg2: memref<2x32xf32, #tpu.memory_space<vmem>>, %arg3: memref<2x32xf32, #tpu.memory_space<vmem>>) attributes {dimension_semantics = [#tpu.dimension_semantics<parallel>], iteration_bounds = array<i64: 1>, scalar_prefetch = 0 : i64, scratch_operands = 0 : i64, tpu.core_type = #tpu.core_type<tc>, window_params = [{transform_indices = @transform_0, window_bounds = array<i64: 2, 8, 32>}, {transform_indices = @transform_1, window_bounds = array<i64: 2, 32>}, {transform_indices = @transform_2, window_bounds = array<i64: 2, 32>}]} {
    %c0 = arith.constant 0 : index
    %c0_0 = arith.constant 0 : index
    %c0_1 = arith.constant 0 : index
    %0 = vector.load %arg1[%c0, %c0_0, %c0_1] : memref<2x8x32xf32, #tpu.memory_space<vmem>>, vector<2x8x32xf32>
    %c0_2 = arith.constant 0 : index
    %c0_3 = arith.constant 0 : index
    %1 = vector.load %arg2[%c0_2, %c0_3] : memref<2x32xf32, #tpu.memory_space<vmem>>, vector<2x32xf32>
    %2 = vector.shape_cast %1 : vector<2x32xf32> to vector<2x1x32xf32>
    %3 = vector.broadcast %2 : vector<2x1x32xf32> to vector<2x8x32xf32>
    %4 = arith.mulf %0, %3 : vector<2x8x32xf32>
    %cst = arith.constant dense<0.000000e+00> : vector<2x8xf32>
    %5 = vector.multi_reduction <add>, %4, %cst [2] : vector<2x8x32xf32> to vector<2x8xf32>
    %6 = vector.shape_cast %5 : vector<2x8xf32> to vector<2x8x1xf32>
    %7 = vector.broadcast %6 : vector<2x8x1xf32> to vector<2x8x32xf32>
    %8 = arith.mulf %0, %7 : vector<2x8x32xf32>
    %cst_4 = arith.constant dense<0.000000e+00> : vector<2x32xf32>
    %9 = vector.multi_reduction <add>, %8, %cst_4 [1] : vector<2x8x32xf32> to vector<2x32xf32>
    %c0_5 = arith.constant 0 : index
    %c0_6 = arith.constant 0 : index
    %10 = vector.load %arg3[%c0_5, %c0_6] : memref<2x32xf32, #tpu.memory_space<vmem>>, vector<2x32xf32>
    tpu.vector_store %arg3[%c0_5, %c0_6], %9 {strides = array<i32>} : memref<2x32xf32, #tpu.memory_space<vmem>>, vector<2x32xf32>,
    return
  }
  func.func @transform_0(%arg0: i32) -> (i32, i32, i32) {
    %c0_i32 = arith.constant 0 : i32
    %c0_i32_0 = arith.constant 0 : i32
    %c0_i32_1 = arith.constant 0 : i32
    return %arg0, %c0_i32, %c0_i32_0 : i32, i32, i32
  }
  func.func @transform_1(%arg0: i32) -> (i32, i32) {
    %c0_i32 = arith.constant 0 : i32
    %c0_i32_0 = arith.constant 0 : i32
    return %arg0, %c0_i32 : i32, i32
  }
  func.func @transform_2(%arg0: i32) -> (i32, i32) {
    %c0_i32 = arith.constant 0 : i32
    %c0_i32_0 = arith.constant 0 : i32
    return %arg0, %c0_i32 : i32, i32
  }
}

</mosaic_0001>

<bundles_post_ra>
// kernel: global_attn.1
= control target key start
LH: loop header
LB: loop body
LE: loop exit
PB: predicated region body
PF: predicated region fallthrough
CT: control target
= control target key end

     0   :  { %v27_v0 = vlaneseq  ;;  %s148_s0 = inlined_call_operand.vmem [shape: f32[2,8,32], index: 0, kind: input, shape index: {}]   ;;  %s149_s1 = inlined_call_operand.vmem [shape: f32[2,32], index: 1, kind: input, shape index: {}]   ;;  %s150_s2 = inlined_call_operand.hbm [shape: f32[2,32], index: 2, kind: output, shape index: {}]  }
   0x1   :  { %7 = vsyncpa [#allocation3], 0  ;;  %v119_v1 = vmov 1966171168   ;;  %v12_v11 = vld [vmem:[%s148_s0] sm:$0xff]  ;;  %v13_v12 = vld [vmem:[%s148_s0 + $0x8] sm:$0xff] }
   0x2   :  { %v25_v2 = vunpack.c.l.s4 %v119_v1  ;;  %v28_v3 = vshrl.u32 %v27_v0, 7  ;;  %v94_v4 = vld.sshfl [vmem:[%s149_s1] sm:$0x11 pattern:$0x75316420]  ;;  %vm50_vm0 = vcmask 261120  }
   0x3   :  { %v23_v5 = vcombine.high %v94_v4, %v94_v4  ;;  %s120_s0 = smov [#allocation2]   ;;  %vm75_vm1 = vcmask 1041409   ;;  %vm78_vm2 = vcmask 254976  }
   0x4   :  { %v26_v6 = vunpack.c.0.s8 %v25_v2  ;;  %v40_v8 = vsub.s32 0, %v28_v3  ;;  %s86_s1 = sshll.u32 %s120_s0, 4  ;;  %s87_s1 = int_to_ptr.vmem [resolvable:$true] %s86_s1 }
   0x5   :  { %s97_s15 = scalar_lea.vmem %s87_s1, 32  ;;  %p102_p1 = scmp.lt.s32.totalorder %s87_s1, %s87_s1 }
   0x6   :  { %v29_v7 = vsub.s32 %v26_v6, %v28_v3  ;;  %p98_p0 = scmp.ne.s32.totalorder %s87_s1, %s97_s15  ;;  %p103_p2 = scmp.lt.s32.totalorder %s97_s15, %s97_s15 }
   0x8   :  { %v30_v9 = vrot.slane %v94_v4, %v29_v7  ;;  %v37_v10 = vrot.slane %v23_v5, %v29_v7  ;;  %p104_p3 = por %p103_p2, %p102_p1 }
   0xa   :  { %v41_v13 = vrot.slane %v30_v9, %v40_v8  ;;  %v45_v14 = vrot.slane %v37_v10, %v40_v8  ;;  %p105_p4 = pnand %p104_p3, %p98_p0 }
   0xc   :  { %v48_v15 = vmul.f32 %v41_v13, %v12_v11  ;;  %v49_v16 = vmul.f32 %v45_v14, %v13_v12 }
   0xe   :  { %v51_v17 = vsel %vm50_vm0, %v48_v15, 0.0  ;;  %v54_v18 = vsel %vm50_vm0, %v49_v16, 0.0 }
   0xf   :  { %52 = vadd.xlane.f32.xlu0 %v51_v17 }
  0x13   :  { %55 = vadd.xlane.f32.xlu0 %v54_v18 }
  0x98   :  { %v53_v19 = vpop.xlane.xlu0 %52 }
  0x99   :  { %v57_v20 = vmul.f32 %v53_v19, %v12_v11 }
  0x9b   :  { %v59_v21 = vsel %vm50_vm0, %v57_v20, 0.0 }
  0x9c   :  { %v60_v22 = vrot.slane %v59_v21, 4  ;;  %v56_v23 = vpop.xlane.xlu0 %55 }
  0x9d   :  { %v58_v24 = vmul.f32 %v56_v23, %v13_v12 }
  0x9e   :  { %v61_v25 = vadd.f32 %v60_v22, %v59_v21 }
  0x9f   :  { %v66_v26 = vsel %vm50_vm0, %v58_v24, 0.0 }
  0xa0   :  { %v62_v27 = vrot.slane %v61_v25, 2  ;;  %v67_v28 = vrot.slane %v66_v26, 4 }
  0xa2   :  { %v63_v29 = vadd.f32 %v62_v27, %v61_v25  ;;  %v68_v30 = vadd.f32 %v67_v28, %v66_v26 }
  0xa4   :  { %v69_v31 = vrot.slane %v68_v30, 2  ;;  %v64_v32 = vrot.slane %v63_v29, 1 }
  0xa6   :  { %v70_v33 = vadd.f32 %v69_v31, %v68_v30  ;;  %v65_v35 = vadd.f32 %v64_v32, %v63_v29 }
  0xa8   :  { %v71_v34 = vrot.slane %v70_v33, 1 }
  0xaa   :  { %v72_v36 = vadd.f32 %v71_v34, %v70_v33 }
  0xac   :  { %v76_v37 = vsel %vm75_vm1, %v72_v36, %v65_v35 }
  0xad   :  { %79 = vst.msk [vmem:[#allocation2] sm:$0x3] %vm78_vm2, %v76_v37 }
  0xae   :  { %108 = shalt.err (!%p105_p4)
}
  0xaf   :  { %89 = dma.vmem_to_hbm [thread:$0]  %s87_s1, 32, %s150_s2, [#allocation3]  }
  0xb0   :  { %117 = dma.done.wait [#allocation3], 32  }
  0xb1   :  { %118 = vsyncadd [#allocation3], 4294967264 }
  0xb2   :  { %93 = vsyncpa [#allocation3], 1 }

</bundles_post_ra>
